<compile_context>
chip_gen: v6e
topology: v6e:2x2x1
jax: 0.10.0
libtpu: 0.0.40
codegen_flags: <defaults>
</compile_context>

<pallas_src>
import math

import numpy as np

import jax
import jax.numpy as jnp
from jax.experimental import pallas as pl
from jax.experimental.pallas import tpu as pltpu

EMB_DIM = 5
MAX_HOUR = 24
MAX_WEEKDAY = 7
FREQUENCIES = (1.0, 2.0, 4.0)
OUT_DIM = 2 * EMB_DIM + 2 * len(FREQUENCIES)   # 16
ONEHOT_K = 32                                  # 24 hour rows + 7 weekday rows + 1 time row
LANE = 128


def _round_up(x, m):
    return ((x + m - 1) // m) * m


def time_key_kernel(packed_ref, table_ref, out_ref):
    """packed_ref: [8, TB]  rows 0/1/2 = hour / weekday / norm_time (batch on lanes)
       table_ref : [16, 32] fused (hour_emb | weekday_emb | phase | 2*pi*freq) table
       out_ref   : [16, TB] feature rows x batch lanes (lane-dense store)."""
    TB = out_ref.shape[1]

    hour = packed_ref[0:1, :]            # [1, TB]
    wday = packed_ref[1:2, :]            # [1, TB]
    t = packed_ref[2:3, :]               # [1, TB]

    # Fused "one-hot + time" activation [32, TB]:
    #   rows 0..23 : hour one-hot, rows 24..30 : weekday one-hot, row 31 : t.
    row_i = jax.lax.broadcasted_iota(jnp.int32, (ONEHOT_K, TB), 0)
    row_f = row_i.astype(jnp.float32)
    oh_hour = (hour == row_f).astype(jnp.float32)
    oh_wday = (wday == (row_f - jnp.float32(MAX_HOUR))).astype(jnp.float32)
    acts = jnp.where(row_i < MAX_HOUR, oh_hour,
                     jnp.where(row_i < MAX_HOUR + MAX_WEEKDAY, oh_wday, t))

    # One MXU push, batch as the N dimension: [16, 32] @ [32, TB] -> [16, TB].
    #   rows 0..9  : hour / weekday embeddings (already "concatenated")
    #   rows 10..15: angle = phase + 2*pi*f*t   (affine folded into the table)
    emb = jnp.dot(table_ref[...], acts, preferred_element_type=jnp.float32)

    # Single EUP sin push + one row-select; full-width, unmasked store.
    out_row = jax.lax.broadcasted_iota(jnp.int32, (OUT_DIM, TB), 0)
    out_ref[...] = jnp.where(out_row >= 2 * EMB_DIM, jnp.sin(emb), emb)


def _build_fused_table(hour_table, weekday_table):
    """[16, 32] table: rows 0..4 hour emb (cols 0..23), rows 5..9 weekday emb
    (cols 24..30), rows 10..15 angle affine: phase on hour cols (one-hot sums
    to 1) and 2*pi*freq on the t column (col 31). Built once at init time."""
    phase = np.tile(np.array([0.0, math.pi / 2.0], np.float32), len(FREQUENCIES))       # [6]
    two_pi_f = np.repeat(2.0 * math.pi * np.asarray(FREQUENCIES, np.float64), 2)
    two_pi_f = two_pi_f.astype(np.float32)                                              # [6]

    top = jnp.concatenate([
        jnp.concatenate(
            [hour_table.astype(jnp.float32).T,
             jnp.zeros((EMB_DIM, ONEHOT_K - MAX_HOUR), jnp.float32)], axis=1),
        jnp.concatenate(
            [jnp.zeros((EMB_DIM, MAX_HOUR), jnp.float32),
             weekday_table.astype(jnp.float32).T,
             jnp.zeros((EMB_DIM, ONEHOT_K - MAX_HOUR - MAX_WEEKDAY), jnp.float32)],
            axis=1),
    ], axis=0)                                                                          # [10, 32]

    bot = np.concatenate([
        np.tile(phase[:, None], (1, MAX_HOUR)),        # phase baked on hour columns ONLY
        np.zeros((2 * len(FREQUENCIES), MAX_WEEKDAY), np.float32),
        two_pi_f[:, None],                             # col 31: coefficient of t
    ], axis=1).astype(np.float32)                                                       # [6, 32]

    return jnp.concatenate([top, jnp.asarray(bot)], axis=0)                             # [16, 32]


def time_key_encoder(hour, weekday, norm_time, hour_table, weekday_table,
                     block_rows=2048):
    B = hour.shape[0]
    # Pick TB (multiple of 128, <= ~block_rows) minimizing padded dead rows.
    n_blocks = max(1, -(-B // block_rows))
    TB = _round_up(-(-B // n_blocks), LANE)
    B_pad = _round_up(B, TB)
    grid = (B_pad // TB,)

    # Lane-dense packed input [8, B_pad]: one stack + one pad (no scatter writes).
    packed = jnp.stack([hour.astype(jnp.float32),
                        weekday.astype(jnp.float32),
                        norm_time.astype(jnp.float32)], axis=0)          # [3, B]
    packed = jnp.pad(packed, ((0, 8 - 3), (0, B_pad - B)))               # [8, B_pad]

    table = _build_fused_table(hour_table, weekday_table)                # [16, 32]

    out_t = pl.pallas_call(
        time_key_kernel,
        out_shape=jax.ShapeDtypeStruct((OUT_DIM, B_pad), jnp.float32),
        grid_spec=pltpu.PrefetchScalarGridSpec(
            num_scalar_prefetch=0,
            grid=grid,
            in_specs=[
                pl.BlockSpec((8, TB), lambda i: (0, i)),
                pl.BlockSpec((OUT_DIM, ONEHOT_K), lambda i: (0, 0)),
            ],
            out_specs=pl.BlockSpec((OUT_DIM, TB), lambda i: (0, i)),
        ),
        compiler_params=pltpu.CompilerParams(
            dimension_semantics=("parallel",)),
    )(packed, table)

    # Module contract is [B, OUT_DIM]; the kernel stores lane-dense [OUT_DIM, B_pad].
    return out_t[:, :B].T


def time_key_encoder_ref(hour, weekday, norm_time, hour_table, weekday_table):
    """Pure-JAX reference mirroring the PyTorch forward."""
    h_emb = hour_table[hour]          # [B, 5]
    w_emb = weekday_table[weekday]    # [B, 5]
    parts = [h_emb, w_emb]
    for f in FREQUENCIES:
        ang = 2.0 * math.pi * f * norm_time
        parts.append(jnp.stack([jnp.sin(ang), jnp.cos(ang)], axis=-1))
    return jnp.concatenate(parts, axis=-1)


if __name__ == "__main__":
    key = jax.random.PRNGKey(0)
    k_h, k_w, k_hour, k_wday, k_t = jax.random.split(key, 5)

    B = 8  # batch of time keys

    # Deterministic parameter init (nn.Embedding default: N(0, 1)).
    hour_table = jax.random.normal(k_h, (MAX_HOUR, EMB_DIM), dtype=jnp.float32)
    weekday_table = jax.random.normal(k_w, (MAX_WEEKDAY, EMB_DIM), dtype=jnp.float32)

    hour = jax.random.randint(k_hour, (B,), 0, MAX_HOUR, dtype=jnp.int32)
    weekday = jax.random.randint(k_wday, (B,), 0, MAX_WEEKDAY, dtype=jnp.int32)
    norm_time = jax.random.uniform(k_t, (B,), dtype=jnp.float32)

    out = time_key_encoder(hour, weekday, norm_time, hour_table, weekday_table)
    out = jax.block_until_ready(out)

    ref = time_key_encoder_ref(hour, weekday, norm_time, hour_table, weekday_table)
    assert out.shape == (B, OUT_DIM)
    assert jnp.allclose(out, ref, atol=2e-5, rtol=1e-5), "mismatch vs reference"

    print("KERNEL_OK")
</pallas_src>

<mosaic_0001>
module attributes {stable_mosaic.version = 11 : i64} {
  func.func @time_key_kernel(%arg0: i32, %arg1: memref<8x128xf32, #tpu.memory_space<vmem>>, %arg2: memref<16x32xf32, #tpu.memory_space<vmem>>, %arg3: memref<16x128xf32, #tpu.memory_space<vmem>>) attributes {dimension_semantics = [#tpu.dimension_semantics<parallel>], iteration_bounds = array<i64: 1>, scalar_prefetch = 0 : i64, scratch_operands = 0 : i64, tpu.core_type = #tpu.core_type<tc>, window_params = [{transform_indices = @transform_0, window_bounds = array<i64: 8, 128>}, {pipeline_mode = #tpu.pipeline_mode<synchronous>, transform_indices = @transform_1, window_bounds = array<i64: 16, 32>}, {transform_indices = @transform_2, window_bounds = array<i64: 16, 128>}]} {
    %c0 = arith.constant 0 : index
    %c0_0 = arith.constant 0 : index
    %0 = vector.load %arg1[%c0, %c0_0] : memref<8x128xf32, #tpu.memory_space<vmem>>, vector<1x128xf32>
    %c1 = arith.constant 1 : index
    %c0_1 = arith.constant 0 : index
    %1 = vector.load %arg1[%c1, %c0_1] : memref<8x128xf32, #tpu.memory_space<vmem>>, vector<1x128xf32>
    %c2 = arith.constant 2 : index
    %c0_2 = arith.constant 0 : index
    %2 = vector.load %arg1[%c2, %c0_2] : memref<8x128xf32, #tpu.memory_space<vmem>>, vector<1x128xf32>
    %3 = tpu.iota {dimensions = array<i32: 0>} : vector<32x128xi32>
    %4 = arith.sitofp %3 : vector<32x128xi32> to vector<32x128xf32>
    %5 = vector.broadcast %0 : vector<1x128xf32> to vector<32x128xf32>
    %6 = arith.cmpf oeq, %5, %4 : vector<32x128xf32>
    %7 = arith.extui %6 : vector<32x128xi1> to vector<32x128xi32>
    %8 = arith.sitofp %7 : vector<32x128xi32> to vector<32x128xf32>
    %cst = arith.constant 2.400000e+01 : f32
    %9 = vector.broadcast %cst : f32 to vector<32x128xf32>
    %10 = arith.subf %4, %9 : vector<32x128xf32>
    %11 = vector.broadcast %1 : vector<1x128xf32> to vector<32x128xf32>
    %12 = arith.cmpf oeq, %11, %10 : vector<32x128xf32>
    %13 = arith.extui %12 : vector<32x128xi1> to vector<32x128xi32>
    %14 = arith.sitofp %13 : vector<32x128xi32> to vector<32x128xf32>
    %c24_i32 = arith.constant 24 : i32
    %15 = vector.broadcast %c24_i32 : i32 to vector<32x128xi32>
    %16 = arith.cmpi slt, %3, %15 : vector<32x128xi32>
    %c31_i32 = arith.constant 31 : i32
    %17 = vector.broadcast %c31_i32 : i32 to vector<32x128xi32>
    %18 = arith.cmpi slt, %3, %17 : vector<32x128xi32>
    %19 = vector.shape_cast %2 : vector<1x128xf32> to vector<1x128xf32>
    %20 = vector.broadcast %19 : vector<1x128xf32> to vector<32x128xf32>
    %21 = arith.select %18, %14, %20 : vector<32x128xi1>, vector<32x128xf32>
    %22 = arith.select %16, %8, %21 : vector<32x128xi1>, vector<32x128xf32>
    %c0_3 = arith.constant 0 : index
    %c0_4 = arith.constant 0 : index
    %23 = vector.load %arg2[%c0_3, %c0_4] : memref<16x32xf32, #tpu.memory_space<vmem>>, vector<16x32xf32>
    %cst_5 = arith.constant dense<0.000000e+00> : vector<16x128xf32>
    %24 = tpu.matmul %23, %22, %cst_5 {dimension_numbers = #tpu.dot_dimension_numbers<[1], [0], [0], [1], [0, 0, 1, 1], [], []>} : vector<16x32xf32>, vector<32x128xf32>, vector<16x128xf32> -> vector<16x128xf32>
    %25 = tpu.iota {dimensions = array<i32: 0>} : vector<16x128xi32>
    %c10_i32 = arith.constant 10 : i32
    %26 = vector.broadcast %c10_i32 : i32 to vector<16x128xi32>
    %27 = arith.cmpi sge, %25, %26 : vector<16x128xi32>
    %28 = math.sin %24 : vector<16x128xf32>
    %29 = arith.select %27, %28, %24 : vector<16x128xi1>, vector<16x128xf32>
    %c0_6 = arith.constant 0 : index
    %c0_7 = arith.constant 0 : index
    %30 = vector.load %arg3[%c0_6, %c0_7] : memref<16x128xf32, #tpu.memory_space<vmem>>, vector<16x128xf32>
    tpu.vector_store %arg3[%c0_6, %c0_7], %29 {strides = array<i32>} : memref<16x128xf32, #tpu.memory_space<vmem>>, vector<16x128xf32>,
    return
  }
  func.func @transform_0(%arg0: i32) -> (i32, i32) {
    %c0_i32 = arith.constant 0 : i32
    %c0_i32_0 = arith.constant 0 : i32
    return %c0_i32, %arg0 : i32, i32
  }
  func.func @transform_1(%arg0: i32) -> (i32, i32) {
    %c0_i32 = arith.constant 0 : i32
    %c0_i32_0 = arith.constant 0 : i32
    %c0_i32_1 = arith.constant 0 : i32
    return %c0_i32, %c0_i32_0 : i32, i32
  }
  func.func @transform_2(%arg0: i32) -> (i32, i32) {
    %c0_i32 = arith.constant 0 : i32
    %c0_i32_0 = arith.constant 0 : i32
    return %c0_i32, %arg0 : i32, i32
  }
}

</mosaic_0001>

<bundles_post_ra>
// kernel: tpu_custom_call.1
= control target key start
LH: loop header
LB: loop body
LE: loop exit
PB: predicated region body
PF: predicated region fallthrough
CT: control target
= control target key end

     0   :  { %7 = vsyncpa [#allocation3], 0  ;;  %s625_s0 = inlined_call_operand.hbm [shape: f32[8,128], index: 0, kind: input, shape index: {}]   ;;  %s626_s1 = inlined_call_operand.hbm [shape: f32[16,32], index: 1, kind: input, shape index: {}]   ;;  %s627_s2 = inlined_call_operand.hbm [shape: f32[16,128], index: 2, kind: output, shape index: {}]  }
   0x1   :  { %8 = vsyncpa [#allocation6], 0 }
   0x2   :  { %9 = vsyncpa [#allocation4], 0  ;;  %s554_s9 = smov [#allocation2]   ;;  %s555_s11 = smov [#allocation5]  }
   0x3   :  { %s16_s10 = sshll.u32 %s554_s9, 4  ;;  %s25_s12 = sshll.u32 %s555_s11, 4  ;;  %s17_s10 = int_to_ptr.vmem [resolvable:$true] %s16_s10  ;;  %s26_s12 = int_to_ptr.vmem [resolvable:$true] %s25_s12 }
   0x4   :  { %s496_s13 = scalar_lea.vmem %s17_s10, 128  ;;  %p501_p1 = scmp.lt.s32.totalorder %s17_s10, %s17_s10 }
   0x5   :  { %p497_p0 = scmp.ne.s32.totalorder %s17_s10, %s496_s13  ;;  %p502_p2 = scmp.lt.s32.totalorder %s496_s13, %s496_s13 }
   0x7   :  { %p503_p3 = por %p502_p2, %p501_p1 }
   0x9   :  { %p504_p4 = pnand %p503_p3, %p497_p0 }
   0xb   :  { %507 = shalt.err (!%p504_p4)
}
   0xc   :  { %19 = dma.hbm_to_vmem [thread:$0]  %s625_s0, 128, %s17_s10, [#allocation3]  }
   0xd   :  { %s516_s16 = scalar_lea.vmem %s26_s12, 256  ;;  %p521_p6 = scmp.lt.s32.totalorder %s26_s12, %s26_s12 }
   0xe   :  { %p517_p5 = scmp.ne.s32.totalorder %s26_s12, %s516_s16  ;;  %p522_p7 = scmp.lt.s32.totalorder %s516_s16, %s516_s16 }
  0x10   :  { %p523_p8 = por %p522_p7, %p521_p6 }
  0x12   :  { %p524_p9 = pnand %p523_p8, %p517_p5 }
  0x14   :  { %527 = shalt.err (!%p524_p9)
}
  0x15   :  { %s556_s17 = smov 128   ;;  %s557_s18 = smov 8  }
  0x16   :  { %31 = dma.hbm_to_vmem [thread:$0]  %s626_s1, 256, %s26_s12, [#allocation6], %s556_s17, %s556_s17, %s557_s18  }
  0x17   :  { %548 = dma.done.wait [#allocation3], 128  }
  0x18   :  { %549 = vsyncadd [#allocation3], 4294967168 }
  0x19   :  { %550 = dma.done.wait [#allocation6], 256  }
  0x1a   :  { %551 = vsyncadd [#allocation6], 4294967040  ;;  %v41_v0 = vlaneseq  ;;  %vm108_vm0 = vcmask 261120   ;;  %v431_v6 = vld [vmem:[#allocation2 + $0x1] ss:$0 sm:$0xff]  ;;  %v106_v9 = vld [vmem:[#allocation5] sm:$0xff] }
  0x1b   :  { %v436_v10 = vld [vmem:[#allocation2 + $0x2] ss:$0 sm:$0xff]  ;;  %v422_v11 = vld [vmem:[#allocation2] ss:$0 sm:$0xff]  ;;  %464 = vmatprep.mubr.msk.f32.mxu0 %vm108_vm0, %v106_v9  ;;  %v558_v13 = vmov 0.0   ;;  %v559_v17 = vmov 1.0  }
  0x1c   :  { %v42_v1 = vshrl.u32 %v41_v0, 7  ;;  %v107_v18 = vld [vmem:[#allocation5 + $0x8] sm:$0xff]  ;;  %v560_v31 = vmov 683565275   ;;  %v561_v33 = vmov 2475754826  }
  0x1d   :  { %v562_v36 = vmov 2131351028   ;;  %v563_v39 = vmov 2102212464   ;;  %v564_v42 = vmov 920167782  }
  0x1e   :  { %v45_v2 = vadd.s32 24, %v42_v1  ;;  %v44_v3 = vadd.s32 16, %v42_v1  ;;  %v591_v5 = vadd.s32 8, %v42_v1  ;;  %v46_v16 = vcvt.s32.f32 %v42_v1  ;;  %s566_s0 = smov [#allocation7]  }
  0x1f   :  { %v565_v45 = vmov 1326507024   ;;  %s409_s1 = sshll.u32 %s566_s0, 4  ;;  %s410_s1 = int_to_ptr.vmem [resolvable:$true] %s409_s1 }
  0x20   :  { %v49_v4 = vcvt.s32.f32 %v45_v2  ;;  %v48_v8 = vcvt.s32.f32 %v44_v3  ;;  %vm93_vm1 = vcmp.lt.s32.totalorder %v45_v2, 31  ;;  %v47_v12 = vcvt.s32.f32 %v591_v5  ;;  %s528_s21 = scalar_lea.vmem %s410_s1, 256  ;;  %p533_p11 = scmp.lt.s32.totalorder %s410_s1, %s410_s1 }
  0x21   :  { %vm54_vm5 = vcmp.eq.f32.partialorder %v422_v11, %v46_v16  ;;  %p529_p10 = scmp.ne.s32.totalorder %s410_s1, %s528_s21  ;;  %p534_p12 = scmp.lt.s32.totalorder %s528_s21, %s528_s21 }
  0x22   :  { %v430_v7 = vadd.f32 -24.0, %v49_v4  ;;  %vm56_vm3 = vcmp.eq.f32.partialorder %v422_v11, %v48_v8  ;;  %vm55_vm4 = vcmp.eq.f32.partialorder %v422_v11, %v47_v12 }
  0x23   :  { %p535_p13 = por %p534_p12, %p533_p11 }
  0x24   :  { %vm77_vm2 = vcmp.eq.f32.partialorder %v431_v6, %v430_v7 }
  0x25   :  { %v435_v14 = vsel %vm77_vm2, 1.0, %v558_v13  ;;  %p536_p0 = pnand %p535_p13, %p529_p10 }
  0x26   :  { %v101_v15 = vsel %vm93_vm1, %v435_v14, %v436_v10  ;;  %vm191_vm1 = vcmp.ge.s32.totalorder %v591_v5, 10 }
  0x27   :  { %456 = vmatprep.subr.mxu0 %v101_v15 }
  0x28   :  { %457 = vmatpush3.msra.mxu0 %v101_v15 }
  0x29   :  { %458 = vmatprep.subr.msk.mxu0 %vm56_vm3, %v559_v17 }
  0x2a   :  { %459 = vmatpush3.msk.msra.mxu0 %vm56_vm3, %v559_v17 }
  0x2b   :  { %460 = vmatprep.subr.msk.mxu0 %vm55_vm4, %v559_v17 }
  0x2c   :  { %461 = vmatpush3.msk.msra.mxu0 %vm55_vm4, %v559_v17 }
  0x2d   :  { %462 = vmatprep.subr.msk.mxu0 %vm54_vm5, %v559_v17 }
  0x2e   :  { %463 = vmatpush3.msk.msra.mxu0 %vm54_vm5, %v559_v17 }
  0x2f   :  { %465 = vmatmul.mubr.msk.f32.vlgmr.msra.gmra.mxu0 %vm108_vm0, %v107_v18 }
  0xef   :  { %v596_v19 = vpop.f32.mrf.mxu0 }
  0xf0   :  { %v299_v20 = vand.u32 2139095040, %v596_v19  ;;  %v296_v25 = vand.u32 2147483647, %v596_v19  ;;  %vm298_vm13 = vcmp.lt.s32.totalorder %v596_v19, 0  ;;  %vm388_vm3 = vweird.f32 %v596_v19 }
  0xf1   :  { %v181_v21 = vpop.f32.mrf.mxu0 }
  0xf2   :  { %v300_v22 = vshrl.u32 %v299_v20, 23  ;;  %402 = vst [vmem:[#allocation7] sm:$0xff] %v181_v21  ;;  %v303_v28 = vand.u32 8388607, %v296_v25  ;;  %vm297_vm14 = vcmp.le.f32.partialorder %v296_v25, 0.7853982 }
  0xf4   :  { %v446_v23 = vadd.s32 4294967169, %v300_v22  ;;  %v304_v47 = vor.u32 8388608, %v303_v28 }
  0xf6   :  { %v306_v24 = vadd.s32 1, %v446_v23  ;;  %v344_v61 = vshll.u32 %v304_v47, 8 }
  0xf8   :  { %vm307_vm6 = vcmp.gt.s32.totalorder %v306_v24, 0 }
  0xf9   :  { %v308_v26 = vsel %vm307_vm6, %v306_v24, 0 }
  0xfa   :  { %v310_v27 = vand.u32 31, %v308_v26  ;;  %v309_v30 = vshrl.u32 %v308_v26, 5 }
  0xfc   :  { %v311_v29 = vsub.s32 32, %v310_v27  ;;  %v313_v32 = vshll.u32 %v560_v31, %v310_v27  ;;  %v316_v34 = vshll.u32 %v561_v33, %v310_v27  ;;  %v319_v38 = vshll.u32 %v562_v36, %v310_v27 }
  0xfd   :  { %v322_v41 = vshll.u32 %v563_v39, %v310_v27  ;;  %v325_v44 = vshll.u32 %v564_v42, %v310_v27  ;;  %vm328_vm7 = vcmp.lt.s32.totalorder %v309_v30, 1  ;;  %vm331_vm8 = vcmp.lt.s32.totalorder %v309_v30, 4 }
  0xfe   :  { %v314_v35 = vshrl.u32 %v561_v33, %v311_v29  ;;  %v317_v37 = vshrl.u32 %v562_v36, %v311_v29  ;;  %v320_v40 = vshrl.u32 %v563_v39, %v311_v29  ;;  %v323_v43 = vshrl.u32 %v564_v42, %v311_v29 }
  0xff   :  { %v326_v46 = vshrl.u32 %v565_v45, %v311_v29  ;;  %v312_v56 = vshrl.u32 %v560_v31, %v311_v29  ;;  %vm330_vm9 = vcmp.lt.s32.totalorder %v309_v30, 3  ;;  %vm329_vm10 = vcmp.lt.s32.totalorder %v309_v30, 2 }
 0x100   :  { %v315_v48 = vor.u32 %v314_v35, %v313_v32  ;;  %v318_v49 = vor.u32 %v317_v37, %v316_v34  ;;  %v321_v50 = vor.u32 %v320_v40, %v319_v38  ;;  %v324_v51 = vor.u32 %v323_v43, %v322_v41 }
 0x101   :  { %v327_v52 = vor.u32 %v326_v46, %v325_v44 }
 0x102   :  { %v333_v53 = vsel %vm331_vm8, %v321_v50, 2102212464  ;;  %v336_v54 = vsel %vm328_vm7, %v315_v48, %v318_v49  ;;  %v340_v55 = vsel %vm328_vm7, %v318_v49, %v321_v50  ;;  %v337_v57 = vsel %vm331_vm8, %v324_v51, 920167782 }
 0x103   :  { %v341_v58 = vsel %vm331_vm8, %v327_v52, 1326507024  ;;  %v338_v59 = vsel %vm330_vm9, %v321_v50, %v337_v57  ;;  %v332_v62 = vsel %vm328_vm7, %v312_v56, %v315_v48  ;;  %v334_v63 = vsel %vm330_vm9, %v318_v49, %v333_v53 }
 0x104   :  { %v342_v60 = vsel %vm330_vm9, %v324_v51, %v341_v58  ;;  %v339_v0 = vsel %vm329_vm10, %v336_v54, %v338_v59  ;;  %v335_v7 = vsel %vm329_vm10, %v332_v62, %v334_v63 }
 0x105   :  { %v343_v1 = vsel %vm329_vm10, %v340_v55, %v342_v60  ;;  %v605_v4 = vmul.u32.u64.low %v344_v61, %v339_v0  ;;  %v606_v6 = vmul.u32.u64.high %v344_v61, %v339_v0, %v605_v4  ;;  %v351_v9 = vmul.u32 %v344_v61, %v335_v7 }
 0x106   :  { %v602_v2 = vmul.u32.u64.low %v344_v61, %v343_v1  ;;  %v603_v3 = vmul.u32.u64.high %v344_v61, %v343_v1, %v602_v2 }
 0x107   :  { %v354_v8 = vadd.s32 1, %v606_v6 }
 0x108   :  { %vm353_vm11 = vc.u32 %v603_v3, %v605_v4  ;;  %v352_v22 = vadd.s32 %v605_v4, %v603_v3 }
 0x109   :  { %v355_v10 = vsel %vm353_vm11, %v354_v8, %v606_v6 }
 0x10a   :  { %v356_v11 = vadd.s32 %v355_v10, %v351_v9 }
 0x10c   :  { %v357_v12 = vadd.s32 536870912, %v356_v11 }
 0x10e   :  { %v358_v13 = vshrl.u32 %v357_v12, 30 }
 0x110   :  { %v359_v14 = vshll.u32 %v358_v13, 30  ;;  %v382_v36 = vsub.s32 4, %v358_v13 }
 0x112   :  { %v360_v15 = vsub.s32 %v356_v11, %v359_v14  ;;  %v383_v39 = vsel %vm298_vm13, %v382_v36, %v358_v13 }
 0x113   :  { %v385_v40 = vsel %vm297_vm14, 0, %v383_v39 }
 0x114   :  { %v362_v16 = vsub.s32 0, %v360_v15  ;;  %v389_v41 = vadd.s32 3, %v385_v40 }
 0x116   :  { %v447_v17 = vmin.u32 %v362_v16, %v360_v15  ;;  %v390_v42 = vand.u32 3, %v389_v41 }
 0x118   :  { %v364_v18 = vclz %v447_v17  ;;  %vm395_vm15 = vcmp.eq.s32.totalorder %v390_v42, 2  ;;  %vm392_vm0 = vcmp.eq.s32.totalorder %v390_v42, 0  ;;  %vm391_vm2 = vcmp.lt.s32.totalorder %v390_v42, 2 }
 0x11a   :  { %v448_v20 = vadd.s32 4294967294, %v364_v18 }
 0x11c   :  { %vm449_vm12 = vcmp.lt.s32.totalorder %v448_v20, 0 }
 0x11d   :  { %v367_v21 = vsel %vm449_vm12, 0, %v448_v20 }
 0x11e   :  { %v368_v23 = vsub.s32 32, %v367_v21  ;;  %v372_v24 = vsub.s32 4294967266, %v367_v21  ;;  %v369_v26 = vshll.u32 %v360_v15, %v367_v21 }
 0x120   :  { %v370_v27 = vshrl.u32 %v352_v22, %v368_v23  ;;  %v373_v28 = vadd.s32 127, %v372_v24 }
 0x122   :  { %v371_v29 = vor.u32 %v370_v27, %v369_v26  ;;  %v374_v30 = vshll.u32 %v373_v28, 23 }
 0x124   :  { %v375_v31 = vor.u32 4788187, %v374_v30  ;;  %v378_v33 = vcvt.s32.f32 %v371_v29 }
 0x126   :  { %v376_v32 = vand.u32 2147483647, %v375_v31 }
 0x128   :  { %v379_v34 = vmul.f32 %v378_v33, %v376_v32 }
 0x12a   :  { %v380_v35 = vxor.u32 2147483648, %v379_v34 }
 0x12c   :  { %v381_v37 = vsel %vm298_vm13, %v380_v35, %v379_v34 }
 0x12d   :  { %v384_v38 = vsel %vm297_vm14, %v596_v19, %v381_v37 }
 0x12e   :  { %484 = vcosq.f32 %v384_v38 }
 0x12f   :  { %486 = vsinq.f32 %v384_v38 }
 0x13b   :  { %v485_v43 = vpop.eup %484 }
 0x13c   :  { %v487_v44 = vpop.eup %486  ;;  %v396_v45 = vxor.u32 2147483648, %v485_v43 }
 0x13d   :  { %v393_v46 = vxor.u32 2147483648, %v487_v44 }
 0x13e   :  { %v397_v47 = vsel %vm395_vm15, %v396_v45, %v487_v44 }
 0x13f   :  { %v394_v25 = vsel %vm392_vm0, %v485_v43, %v393_v46 }
 0x140   :  { %v398_v48 = vsel %vm391_vm2, %v394_v25, %v397_v47 }
 0x141   :  { %v399_v49 = vsel %vm388_vm3, nan, %v398_v48 }
 0x142   :  { %v401_v50 = vsel %vm191_vm1, %v399_v49, %v596_v19 }
 0x143   :  { %403 = vst [vmem:[#allocation7 + $0x8] sm:$0xff] %v401_v50 }
 0x144   :  { %539 = shalt.err (!%p536_p0)
}
 0x145   :  { %415 = dma.vmem_to_hbm [thread:$0]  %s410_s1, 256, %s627_s2, [#allocation4], %s556_s17, %s556_s17, %s557_s18  }
 0x146   :  { %552 = dma.done.wait [#allocation4], 256  }
 0x147   :  { %553 = vsyncadd [#allocation4], 4294967040 }
 0x148   :  { %419 = vsyncpa [#allocation3], 1 }
 0x149   :  { %420 = vsyncpa [#allocation6], 1 }
 0x14a   :  { %421 = vsyncpa [#allocation4], 1 }

</bundles_post_ra>
